<compile_context>
chip_gen: v5e
topology: v5e:2x2
jax: 0.10.0
libtpu: 0.0.40
codegen_flags: <defaults>
</compile_context>

<pallas_src>
import math
import numpy as np
import jax
import jax.numpy as jnp
from jax.experimental import pallas as pl
from jax.experimental.pallas import tpu as pltpu


# ----------------------------- host-side helpers -----------------------------

def dct_matrix(kernel_size: int) -> np.ndarray:
    """Same construction as DCT.__init__ (deterministic, no checkpoint)."""
    A = np.zeros((kernel_size, kernel_size), dtype=np.float64)
    for i in range(kernel_size):
        for j in range(kernel_size):
            scale = math.sqrt(1.0 / kernel_size) if i == 0 else math.sqrt(2.0 / kernel_size)
            A[i, j] = scale * math.cos((j + 0.5) * math.pi * i / kernel_size)
    return A


def block_diag(A: np.ndarray, n_blocks: int) -> np.ndarray:
    k = A.shape[0]
    out = np.zeros((n_blocks * k, n_blocks * k), dtype=A.dtype)
    for b in range(n_blocks):
        out[b * k:(b + 1) * k, b * k:(b + 1) * k] = A
    return out


def _lane_target() -> int:
    """MXU contraction depth: 256 on v6e/v7x, 128 on older generations."""
    try:
        kind = jax.devices()[0].device_kind.lower()
    except Exception:
        return 256
    if any(v in kind for v in ("v2", "v3", "v4", "v5")):
        return 128
    return 256


def _pick_row_group(W: int, H: int, k: int, lane_target: int) -> int:
    """Largest gw = m*k with m | (W/k) and gw*H <= lane_target (else gw = k)."""
    q = W // k
    divisors = [m for m in range(1, q + 1) if q % m == 0]
    cands = [m for m in divisors if m * k * H <= lane_target]
    m = max(cands) if cands else 1
    return m * k


# --------------------------------- kernel ------------------------------------

def _dct_kernel(q_ref, x_ref, o_ref):
    # q_ref: (D, D) fused DCT weight (grid-invariant, resident in VMEM)
    # x_ref: (TB, D) TB row-groups, lane-dense
    o_ref[...] = jnp.dot(
        x_ref[...], q_ref[...], preferred_element_type=jnp.float32
    ).astype(o_ref.dtype)


# -------------------------------- wrapper -------------------------------------

def dct_forward(x: jnp.ndarray, kernel_size: int,
                *, vmem_tile_budget_bytes: int = 16 * 1024 * 1024) -> jnp.ndarray:
    x_shape = x.shape
    W, H = int(x_shape[-2]), int(x_shape[-1])
    k = kernel_size
    assert W % k == 0 and H % k == 0, "W and H must be divisible by kernel_size"
    B = int(np.prod(x_shape[:-2])) if len(x_shape) > 2 else 1
    itemsize = np.dtype(x.dtype).itemsize

    lane_target = _lane_target()
    gw = _pick_row_group(W, H, k, lane_target)
    D = gw * H
    if 4 * D * D > 16 * 1024 * 1024:
        # TODO(synk): very large H (k*H > ~2048) needs a separable two-matmul
        # path to keep the weight in VMEM; not needed for typical block-DCT use.
        raise ValueError(f"fused DCT weight ({D}x{D}) too large for VMEM")

    # Fused constant weight: out_row = in_row @ Qc, built exactly in float64.
    A = dct_matrix(k)
    m_rows = block_diag(A, gw // k)            # row transform within a group (gw, gw)
    n_cols = block_diag(A, H // k)             # column transform             (H, H)
    Qc = jnp.asarray(np.kron(m_rows.T, n_cols.T), dtype=x.dtype)   # (D, D)

    # Free row-major reshape: no transpose, no extra HBM pass.
    R = B * (W // gw)
    xf = x.reshape(R, D)

    # ---- Row tiling: big lane-dense blocks; prefer exact division and even steps.
    bytes_per_row = 4 * D * itemsize           # in + out, double buffered
    tb_max = max(8, (vmem_tile_budget_bytes // bytes_per_row) // 8 * 8)
    steps_min = max(1, -(-R // tb_max))
    if R >= 256:
        steps_min = max(steps_min, 2)          # keep both v7x TensorCores busy
    best = None
    for steps in range(steps_min, steps_min + 8):
        tb = -(-R // steps)
        if steps > 1:
            tb = -(-tb // 8) * 8               # multiple of 8 (sublane tiling)
        if tb > tb_max and steps != steps_min:
            continue
        pad = steps * tb - R
        key = (pad > 0,                        # no padding pass if possible
               steps > 1 and steps % 2 == 1,   # prefer even step counts (v7x)
               pad, steps)
        if best is None or key < best[0]:
            best = (key, steps, tb)
    _, steps, TB = best
    R_pad = steps * TB
    if R_pad != R:
        xf = jnp.pad(xf, ((0, R_pad - R), (0, 0)))

    # VMEM working set: x + out double-buffered + resident weight (+25% slack).
    wset = 2 * 2 * TB * D * itemsize + 2 * D * D * itemsize
    vmem_limit = int(min(max(wset + wset // 4 + (1 << 20), 4 << 20), 56 << 20))

    cost = pl.CostEstimate(
        flops=int(2 * R_pad * D * D),
        transcendentals=0,
        bytes_accessed=int((2 * R_pad * D + D * D) * itemsize),
    )

    out = pl.pallas_call(
        _dct_kernel,
        out_shape=jax.ShapeDtypeStruct((R_pad, D), x.dtype),
        grid=(steps,),
        in_specs=[
            pl.BlockSpec((D, D), lambda s: (0, 0)),     # weight: fetched once, resident
            pl.BlockSpec((TB, D), lambda s: (s, 0)),
        ],
        out_specs=pl.BlockSpec((TB, D), lambda s: (s, 0)),
        compiler_params=pltpu.CompilerParams(
            dimension_semantics=("parallel",),
            vmem_limit_bytes=vmem_limit,
        ),
        cost_estimate=cost,
    )(Qc, xf)

    if R_pad != R:
        out = out[:R]
    return out.reshape(x_shape)


# ------------------------------- reference -----------------------------------

def dct_reference(x, kernel_size: int) -> np.ndarray:
    """Pure-numpy (float64) reference mirroring the PyTorch per-block loop."""
    x_shape = x.shape
    W, H = x_shape[-2], x_shape[-1]
    A = dct_matrix(kernel_size)
    xf = np.asarray(x, dtype=np.float64).reshape(-1, W, H)
    ret = np.zeros_like(xf)
    k = kernel_size
    for i in range(0, W, k):
        for j in range(0, H, k):
            blk = xf[:, i:i + k, j:j + k]
            ret[:, i:i + k, j:j + k] = A @ blk @ A.T
    return ret.reshape(x_shape)


def _check(x, kernel_size, **kw):
    out = jax.block_until_ready(dct_forward(x, kernel_size, **kw))
    ref = dct_reference(x, kernel_size)
    assert out.shape == x.shape
    err = float(np.max(np.abs(np.asarray(out, dtype=np.float64) - ref)))
    assert err < 1e-4, f"mismatch vs reference: {err}"


if __name__ == "__main__":
    kernel_size = 4

    # Primary test: shape consistent with the module docs ([*, W, H]).
    x = jax.random.normal(jax.random.PRNGKey(0), (2, 4, 16, 16), dtype=jnp.float32)
    _check(x, kernel_size)

    # Larger batch, single grid step, plain 3-D input.
    x2 = jax.random.normal(jax.random.PRNGKey(1), (40, 16, 16), dtype=jnp.float32)
    _check(x2, kernel_size)

    # Multi-step grid + row padding path (tiny VMEM budget forces several steps).
    x3 = jax.random.normal(jax.random.PRNGKey(2), (37, 16, 16), dtype=jnp.float32)
    _check(x3, kernel_size, vmem_tile_budget_bytes=64 * 1024)

    # W larger than the row group (multiple row-groups per image).
    x4 = jax.random.normal(jax.random.PRNGKey(3), (3, 32, 16), dtype=jnp.float32)
    _check(x4, kernel_size)

    print("KERNEL_OK")
</pallas_src>

<mosaic_0001>
module attributes {stable_mosaic.version = 11 : i64} {
  func.func @_dct_kernel(%arg0: i32, %arg1: memref<256x256xf32, #tpu.memory_space<vmem>>, %arg2: memref<8x256xf32, #tpu.memory_space<vmem>>, %arg3: memref<8x256xf32, #tpu.memory_space<vmem>>) attributes {dimension_semantics = [#tpu.dimension_semantics<parallel>], iteration_bounds = array<i64: 1>, scalar_prefetch = 0 : i64, scratch_operands = 0 : i64, tpu.core_type = #tpu.core_type<tc>, window_params = [{pipeline_mode = #tpu.pipeline_mode<synchronous>, transform_indices = @transform_0, window_bounds = array<i64: 256, 256>}, {transform_indices = @transform_1, window_bounds = array<i64: 8, 256>}, {transform_indices = @transform_2, window_bounds = array<i64: 8, 256>}]} {
    %c0 = arith.constant 0 : index
    %c0_0 = arith.constant 0 : index
    %0 = vector.load %arg2[%c0, %c0_0] : memref<8x256xf32, #tpu.memory_space<vmem>>, vector<8x256xf32>
    %c0_1 = arith.constant 0 : index
    %c0_2 = arith.constant 0 : index
    %1 = vector.load %arg1[%c0_1, %c0_2] : memref<256x256xf32, #tpu.memory_space<vmem>>, vector<256x256xf32>
    %cst = arith.constant dense<0.000000e+00> : vector<8x256xf32>
    %2 = tpu.matmul %0, %1, %cst {dimension_numbers = #tpu.dot_dimension_numbers<[1], [0], [0], [1], [0, 0, 1, 1], [], []>} : vector<8x256xf32>, vector<256x256xf32>, vector<8x256xf32> -> vector<8x256xf32>
    %c0_3 = arith.constant 0 : index
    %c0_4 = arith.constant 0 : index
    %3 = vector.load %arg3[%c0_3, %c0_4] : memref<8x256xf32, #tpu.memory_space<vmem>>, vector<8x256xf32>
    tpu.vector_store %arg3[%c0_3, %c0_4], %2 {strides = array<i32>} : memref<8x256xf32, #tpu.memory_space<vmem>>, vector<8x256xf32>,
    return
  }
  func.func @transform_0(%arg0: i32) -> (i32, i32) {
    %c0_i32 = arith.constant 0 : i32
    %c0_i32_0 = arith.constant 0 : i32
    %c0_i32_1 = arith.constant 0 : i32
    return %c0_i32, %c0_i32_0 : i32, i32
  }
  func.func @transform_1(%arg0: i32) -> (i32, i32) {
    %c0_i32 = arith.constant 0 : i32
    %c0_i32_0 = arith.constant 0 : i32
    return %arg0, %c0_i32 : i32, i32
  }
  func.func @transform_2(%arg0: i32) -> (i32, i32) {
    %c0_i32 = arith.constant 0 : i32
    %c0_i32_0 = arith.constant 0 : i32
    return %arg0, %c0_i32 : i32, i32
  }
}

</mosaic_0001>

<bundles_post_ra>
// kernel: tpu_custom_call.1
= control target key start
LH: loop header
LB: loop body
LE: loop exit
PB: predicated region body
PF: predicated region fallthrough
CT: control target
= control target key end

     0   :  { %7 = vsyncpa [#allocation3], 0  ;;  %s320_s0 = inlined_call_operand.hbm [shape: f32[256,256], index: 0, kind: input, shape index: {}]   ;;  %s321_s1 = inlined_call_operand.hbm [shape: f32[8,256], index: 1, kind: input, shape index: {}]   ;;  %s322_s2 = inlined_call_operand.hbm [shape: f32[8,256], index: 2, kind: output, shape index: {}]  }
   0x1   :  { %8 = vsyncpa [#allocation6], 0 }
   0x2   :  { %9 = vsyncpa [#allocation4], 0  ;;  %s14_s11 = sshll.u32 %s320_s0, 4  ;;  %s291_s12 = smov [#allocation2]   ;;  %s15_s11 = int_to_ptr.hbm [resolvable:$true] %s14_s11 }
   0x3   :  { %s16_s13 = sshll.u32 %s291_s12, 4  ;;  %s28_s16 = sshll.u32 %s321_s1, 4  ;;  %s17_s13 = int_to_ptr.vmem [resolvable:$true] %s16_s13  ;;  %s29_s16 = int_to_ptr.hbm [resolvable:$true] %s28_s16 }
   0x4   :  { %s292_s17 = smov 256   ;;  %s293_s18 = smov 16  }
   0x5   :  { %22 = dma.hbm_to_vmem [thread:$0]  %s15_s11, 8192, %s17_s13, [#allocation3], %s292_s17, %s292_s17, %s293_s18  }
   0x6   :  { %s294_s19 = smov [#allocation5]  }
   0x7   :  { %s30_s20 = sshll.u32 %s294_s19, 4  ;;  %s31_s20 = int_to_ptr.vmem [resolvable:$true] %s30_s20 }
   0x8   :  { %33 = dma.hbm_to_vmem [thread:$0]  %s29_s16, 256, %s31_s20, [#allocation6]  }
   0x9   :  { %285 = dma.done.wait [#allocation3], 8192  }
   0xa   :  { %286 = vsyncadd [#allocation3], 4294959104 }
   0xb   :  { %287 = dma.done.wait [#allocation6], 256  }
   0xc   :  { %288 = vsyncadd [#allocation6], 4294967040  ;;  %v75_v0 = vld [vmem:[#allocation2 + $0xf8] sm:$0xff]  ;;  %v73_v2 = vld [vmem:[#allocation2 + $0xe8] sm:$0xff]  ;;  %s295_s0 = smov [#allocation7]   ;;  %s197_s23 = sshll.u32 %s322_s2, 4  ;;  %s198_s23 = int_to_ptr.hbm [resolvable:$true] %s197_s23 }
   0xd   :  { %v107_v1 = vld [vmem:[#allocation2 + $0x1f8] sm:$0xff]  ;;  %148 = vmatpush.msra.mxu2 %v75_v0  ;;  %v105_v3 = vld [vmem:[#allocation2 + $0x1e8] sm:$0xff]  ;;  %v74_v6 = vld [vmem:[#allocation2 + $0xf0] sm:$0xff]  ;;  %s195_s1 = sshll.u32 %s295_s0, 4  ;;  %s196_s1 = int_to_ptr.vmem [resolvable:$true] %s195_s1 }
   0xe   :  { %168 = vmatpush.msra.mxu3 %v107_v1  ;;  %v71_v4 = vld [vmem:[#allocation2 + $0xd8] sm:$0xff]  ;;  %v106_v7 = vld [vmem:[#allocation2 + $0x1f0] sm:$0xff]  ;;  %v72_v8 = vld [vmem:[#allocation2 + $0xe0] sm:$0xff]  ;;  %108 = vmatpush.msra.mxu0 %v74_v6 }
   0xf   :  { %v103_v5 = vld [vmem:[#allocation2 + $0x1d8] sm:$0xff]  ;;  %149 = vmatpush.msra.mxu2 %v73_v2  ;;  %v104_v9 = vld [vmem:[#allocation2 + $0x1e0] sm:$0xff]  ;;  %128 = vmatpush.msra.mxu1 %v106_v7  ;;  %v69_v10 = vld [vmem:[#allocation2 + $0xc8] sm:$0xff] }
  0x10   :  { %169 = vmatpush.msra.mxu3 %v105_v3  ;;  %v101_v11 = vld [vmem:[#allocation2 + $0x1c8] sm:$0xff]  ;;  %v70_v12 = vld [vmem:[#allocation2 + $0xd0] sm:$0xff]  ;;  %109 = vmatpush.msra.mxu0 %v72_v8  ;;  %v67_v14 = vld [vmem:[#allocation2 + $0xb8] sm:$0xff] }
  0x11   :  { %150 = vmatpush.msra.mxu2 %v71_v4  ;;  %v102_v13 = vld [vmem:[#allocation2 + $0x1d0] sm:$0xff]  ;;  %129 = vmatpush.msra.mxu1 %v104_v9  ;;  %v99_v15 = vld [vmem:[#allocation2 + $0x1b8] sm:$0xff]  ;;  %v68_v16 = vld [vmem:[#allocation2 + $0xc0] sm:$0xff] }
  0x12   :  { %170 = vmatpush.msra.mxu3 %v103_v5  ;;  %v100_v17 = vld [vmem:[#allocation2 + $0x1c0] sm:$0xff]  ;;  %110 = vmatpush.msra.mxu0 %v70_v12  ;;  %v65_v18 = vld [vmem:[#allocation2 + $0xa8] sm:$0xff]  ;;  %v66_v20 = vld [vmem:[#allocation2 + $0xb0] sm:$0xff] }
  0x13   :  { %151 = vmatpush.msra.mxu2 %v69_v10  ;;  %130 = vmatpush.msra.mxu1 %v102_v13  ;;  %v97_v19 = vld [vmem:[#allocation2 + $0x1a8] sm:$0xff]  ;;  %v98_v21 = vld [vmem:[#allocation2 + $0x1b0] sm:$0xff]  ;;  %v63_v22 = vld [vmem:[#allocation2 + $0x98] sm:$0xff] }
  0x14   :  { %171 = vmatpush.msra.mxu3 %v101_v11  ;;  %111 = vmatpush.msra.mxu0 %v68_v16  ;;  %v95_v23 = vld [vmem:[#allocation2 + $0x198] sm:$0xff]  ;;  %v64_v24 = vld [vmem:[#allocation2 + $0xa0] sm:$0xff]  ;;  %v61_v26 = vld [vmem:[#allocation2 + $0x88] sm:$0xff] }
  0x15   :  { %152 = vmatpush.msra.mxu2 %v67_v14  ;;  %131 = vmatpush.msra.mxu1 %v100_v17  ;;  %v96_v25 = vld [vmem:[#allocation2 + $0x1a0] sm:$0xff]  ;;  %v93_v27 = vld [vmem:[#allocation2 + $0x188] sm:$0xff]  ;;  %v62_v28 = vld [vmem:[#allocation2 + $0x90] sm:$0xff] }
  0x16   :  { %172 = vmatpush.msra.mxu3 %v99_v15  ;;  %112 = vmatpush.msra.mxu0 %v66_v20  ;;  %v94_v29 = vld [vmem:[#allocation2 + $0x190] sm:$0xff]  ;;  %v59_v30 = vld [vmem:[#allocation2 + $0x78] sm:$0xff]  ;;  %v60_v32 = vld [vmem:[#allocation2 + $0x80] sm:$0xff] }
  0x17   :  { %153 = vmatpush.msra.mxu2 %v65_v18  ;;  %132 = vmatpush.msra.mxu1 %v98_v21  ;;  %v91_v31 = vld [vmem:[#allocation2 + $0x178] sm:$0xff]  ;;  %v92_v33 = vld [vmem:[#allocation2 + $0x180] sm:$0xff]  ;;  %v57_v34 = vld [vmem:[#allocation2 + $0x68] sm:$0xff] }
  0x18   :  { %173 = vmatpush.msra.mxu3 %v97_v19  ;;  %113 = vmatpush.msra.mxu0 %v64_v24  ;;  %v89_v35 = vld [vmem:[#allocation2 + $0x168] sm:$0xff]  ;;  %v58_v36 = vld [vmem:[#allocation2 + $0x70] sm:$0xff]  ;;  %v55_v38 = vld [vmem:[#allocation2 + $0x58] sm:$0xff] }
  0x19   :  { %154 = vmatpush.msra.mxu2 %v63_v22  ;;  %133 = vmatpush.msra.mxu1 %v96_v25  ;;  %v90_v37 = vld [vmem:[#allocation2 + $0x170] sm:$0xff]  ;;  %v87_v39 = vld [vmem:[#allocation2 + $0x158] sm:$0xff]  ;;  %v56_v40 = vld [vmem:[#allocation2 + $0x60] sm:$0xff] }
  0x1a   :  { %174 = vmatpush.msra.mxu3 %v95_v23  ;;  %114 = vmatpush.msra.mxu0 %v62_v28  ;;  %v88_v41 = vld [vmem:[#allocation2 + $0x160] sm:$0xff]  ;;  %v53_v42 = vld [vmem:[#allocation2 + $0x48] sm:$0xff]  ;;  %v54_v44 = vld [vmem:[#allocation2 + $0x50] sm:$0xff] }
  0x1b   :  { %155 = vmatpush.msra.mxu2 %v61_v26  ;;  %134 = vmatpush.msra.mxu1 %v94_v29  ;;  %v85_v43 = vld [vmem:[#allocation2 + $0x148] sm:$0xff]  ;;  %v86_v45 = vld [vmem:[#allocation2 + $0x150] sm:$0xff]  ;;  %v51_v46 = vld [vmem:[#allocation2 + $0x38] sm:$0xff] }
  0x1c   :  { %175 = vmatpush.msra.mxu3 %v93_v27  ;;  %115 = vmatpush.msra.mxu0 %v60_v32  ;;  %v83_v47 = vld [vmem:[#allocation2 + $0x138] sm:$0xff]  ;;  %v52_v48 = vld [vmem:[#allocation2 + $0x40] sm:$0xff]  ;;  %v49_v50 = vld [vmem:[#allocation2 + $0x28] sm:$0xff] }
  0x1d   :  { %156 = vmatpush.msra.mxu2 %v59_v30  ;;  %135 = vmatpush.msra.mxu1 %v92_v33  ;;  %v84_v49 = vld [vmem:[#allocation2 + $0x140] sm:$0xff]  ;;  %v81_v51 = vld [vmem:[#allocation2 + $0x128] sm:$0xff]  ;;  %v50_v52 = vld [vmem:[#allocation2 + $0x30] sm:$0xff] }
  0x1e   :  { %176 = vmatpush.msra.mxu3 %v91_v31  ;;  %116 = vmatpush.msra.mxu0 %v58_v36  ;;  %v82_v53 = vld [vmem:[#allocation2 + $0x130] sm:$0xff]  ;;  %v47_v54 = vld [vmem:[#allocation2 + $0x18] sm:$0xff]  ;;  %v48_v56 = vld [vmem:[#allocation2 + $0x20] sm:$0xff] }
  0x1f   :  { %157 = vmatpush.msra.mxu2 %v57_v34  ;;  %136 = vmatpush.msra.mxu1 %v90_v37  ;;  %v79_v55 = vld [vmem:[#allocation2 + $0x118] sm:$0xff]  ;;  %v80_v57 = vld [vmem:[#allocation2 + $0x120] sm:$0xff]  ;;  %v45_v58 = vld [vmem:[#allocation2 + $0x8] sm:$0xff] }
  0x20   :  { %177 = vmatpush.msra.mxu3 %v89_v35  ;;  %117 = vmatpush.msra.mxu0 %v56_v40  ;;  %v77_v59 = vld [vmem:[#allocation2 + $0x108] sm:$0xff]  ;;  %v42_v60 = vld [vmem:[#allocation5] sm:$0xff]  ;;  %v46_v62 = vld [vmem:[#allocation2 + $0x10] sm:$0xff] }
  0x21   :  { %158 = vmatpush.msra.mxu2 %v55_v38  ;;  %137 = vmatpush.msra.mxu1 %v88_v41  ;;  %v43_v61 = vld [vmem:[#allocation5 + $0x8] sm:$0xff]  ;;  %v78_v63 = vld [vmem:[#allocation2 + $0x110] sm:$0xff]  ;;  %v44_v0 = vld [vmem:[#allocation2] sm:$0xff] }
  0x22   :  { %178 = vmatpush.msra.mxu3 %v87_v39  ;;  %118 = vmatpush.msra.mxu0 %v54_v44  ;;  %v76_v1 = vld [vmem:[#allocation2 + $0x100] sm:$0xff] }
  0x23   :  { %159 = vmatpush.msra.mxu2 %v53_v42  ;;  %138 = vmatpush.msra.mxu1 %v86_v45 }
  0x24   :  { %179 = vmatpush.msra.mxu3 %v85_v43  ;;  %119 = vmatpush.msra.mxu0 %v52_v48 }
  0x25   :  { %160 = vmatpush.msra.mxu2 %v51_v46  ;;  %139 = vmatpush.msra.mxu1 %v84_v49 }
  0x26   :  { %180 = vmatpush.msra.mxu3 %v83_v47  ;;  %120 = vmatpush.msra.mxu0 %v50_v52 }
  0x27   :  { %161 = vmatpush.msra.mxu2 %v49_v50  ;;  %140 = vmatpush.msra.mxu1 %v82_v53 }
  0x28   :  { %181 = vmatpush.msra.mxu3 %v81_v51  ;;  %121 = vmatpush.msra.mxu0 %v48_v56 }
  0x29   :  { %162 = vmatpush.msra.mxu2 %v47_v54  ;;  %141 = vmatpush.msra.mxu1 %v80_v57 }
  0x2a   :  { %182 = vmatpush.msra.mxu3 %v79_v55  ;;  %122 = vmatpush.msra.mxu0 %v46_v62 }
  0x2b   :  { %163 = vmatpush.msra.mxu2 %v45_v58  ;;  %142 = vmatpush.msra.mxu1 %v78_v63 }
  0x2c   :  { %183 = vmatpush.msra.mxu3 %v77_v59  ;;  %164 = vmatmul.f32.vlgmr.msra.gmra.mxu2 %v42_v60 }
  0x2d   :  { %184 = vmatmul.f32.vlgmr.msra.gmra.mxu3 %v43_v61  ;;  %123 = vmatpush.msra.mxu0 %v44_v0 }
  0x2e   :  { %143 = vmatpush.msra.mxu1 %v76_v1  ;;  %124 = vmatmul.f32.vlgmr.msra.gmra.mxu0 %v42_v60 }
  0x2f   :  { %144 = vmatmul.f32.vlgmr.msra.gmra.mxu1 %v43_v61 }
  0xab   :  { %v125_v2 = vpop.f32.mrf.mxu0 }
  0xac   :  { %v145_v3 = vpop.f32.mrf.mxu1 }
  0xad   :  { %v146_v4 = vadd.f32 %v145_v3, %v125_v2 }
  0xaf   :  { %v165_v5 = vpop.f32.mrf.mxu2  ;;  %188 = vst [vmem:[#allocation7] sm:$0xff] %v146_v4 }
  0xb0   :  { %v185_v6 = vpop.f32.mrf.mxu3 }
  0xb1   :  { %v186_v7 = vadd.f32 %v185_v6, %v165_v5 }
  0xb3   :  { %189 = vst [vmem:[#allocation7 + $0x8] sm:$0xff] %v186_v7 }
  0xb4   :  { %200 = dma.vmem_to_hbm [thread:$0]  %s196_s1, 256, %s198_s23, [#allocation4]  }
  0xb5   :  { %289 = dma.done.wait [#allocation4], 256  }
  0xb6   :  { %290 = vsyncadd [#allocation4], 4294967040 }
  0xb7   :  { %205 = vsyncpa [#allocation3], 1 }
  0xb8   :  { %206 = vsyncpa [#allocation6], 1 }
  0xb9   :  { %207 = vsyncpa [#allocation4], 1 }

</bundles_post_ra>
